<compile_context>
chip_gen: v5e
topology: v5e:2x2
jax: 0.10.0
libtpu: 0.0.40
codegen_flags: <defaults>
</compile_context>

<pallas_src>
import jax
import jax.numpy as jnp
from jax.experimental import pallas as pl
from jax.experimental.pallas import tpu as pltpu


def _model_kernel(x3_ref, t4_ref, t13_ref, t12_ref):
    # x3_ref  : (Bt, K, Nt)  per-step bmm RHS tile
    # t4_ref  : (M, Nt)      fixed "randn" factor, shared across batches
    # t13/t12 : (Bt, M, Nt)
    #
    # t3 = bmm(ones(M,K), x3)  ==  broadcast over M of sum_k x3[b, k, n]
    colsum = jnp.sum(x3_ref[...], axis=1, keepdims=True)            # (Bt, 1, Nt)
    # t5 = t3 * t4  -> (Bt, 1, Nt) * (1, M, Nt) broadcast
    prod = colsum * t4_ref[...][None, :, :]                          # (Bt, M, Nt)
    # Folded chain: t11 = -t5  =>  t13 = 1 - t5 ; t12 = 1 + t5
    t13_ref[...] = 1.0 - prod
    t12_ref[...] = 1.0 + prod


def _choose_tiles(B, M, K, N):
    """Pick (Bt, Nt) so one grid step's single-buffer footprint fits the budget.

    Budget 12 MiB/step => ~24 MiB with 2-deep double buffering, under the
    default/explicit scoped-VMEM limit on v5e/v6e/v7x with headroom.
    """
    item = 4  # f32
    budget = 12 * 1024 * 1024

    def step_bytes(bt, nt):
        return item * nt * (bt * K + M + 2 * bt * M)

    # Small-problem fast path: one single step covering everything.
    if step_bytes(B, N) <= budget:
        return B, N

    # Otherwise one batch per step; tile N lane-dense (multiples of 128).
    bt = 1
    if N % 128 == 0:
        candidates = [nt for nt in range(N, 0, -128) if N % nt == 0]
    else:
        candidates = [N]  # fall back to full N (can't keep 128-alignment)
    for nt in candidates:
        if step_bytes(bt, nt) <= budget:
            return bt, nt
    return bt, candidates[-1]


def model_forward(x2, x3, t4):
    """x2 is unused (as in the original module). x3: (B, K, N) f32, t4: (M, N) f32."""
    del x2  # unused in the original forward
    B, K, N = x3.shape
    M = t4.shape[0]

    # TODO(synk): original shapes ([10,1000,16000,1] bmm [1024,256], y2/y3 constants)
    # are mutually inconsistent / non-broadcastable; repaired to (B,K,N) x shared (M,N).
    # The float64 ones intermediate (t1 -> t2) is skipped: ones are exact in f32 and
    # its only effect (t2*2 == 2, t2*3 == 3) is folded into the elementwise chain.
    Bt, Nt = _choose_tiles(B, M, K, N)
    grid = (B // Bt, pl.cdiv(N, Nt))

    grid_spec = pltpu.PrefetchScalarGridSpec(
        num_scalar_prefetch=0,
        grid=grid,
        in_specs=[
            pl.BlockSpec((Bt, K, Nt), lambda b, n: (b, 0, n)),   # x3 tile
            pl.BlockSpec((M, Nt), lambda b, n: (0, n)),          # t4, shared over batch
        ],
        out_specs=[
            pl.BlockSpec((Bt, M, Nt), lambda b, n: (b, 0, n)),   # t13
            pl.BlockSpec((Bt, M, Nt), lambda b, n: (b, 0, n)),   # t12
        ],
    )

    t13, t12 = pl.pallas_call(
        _model_kernel,
        out_shape=(
            jax.ShapeDtypeStruct((B, M, N), jnp.float32),
            jax.ShapeDtypeStruct((B, M, N), jnp.float32),
        ),
        grid_spec=grid_spec,
        compiler_params=pltpu.CompilerParams(
            # Both axes independent: megacore-shards across v7x's two TCs,
            # no-op on single-TC v5e/v6e.
            dimension_semantics=("parallel", "parallel"),
            # Explicit scoped-VMEM limit, safe on all generations (<= 64 MiB v7x).
            vmem_limit_bytes=32 * 1024 * 1024,
        ),
    )(x3, t4)
    return t13, t12


if __name__ == "__main__":
    # Small shapes consistent with the module's structure (batched matmul + elementwise chain).
    B, M, K, N = 2, 8, 32, 256

    key = jax.random.PRNGKey(0)
    k_x2, k_x3, k_t4 = jax.random.split(key, 3)

    x2 = jax.random.normal(k_x2, (B, M, K), dtype=jnp.float32)   # unused, as in the module
    x3 = jax.random.normal(k_x3, (B, K, N), dtype=jnp.float32)
    # t4 = torch.randn(...) in the original -- made a deterministic input here.
    t4 = jax.random.normal(k_t4, (M, N), dtype=jnp.float32)

    t13, t12 = model_forward(x2, x3, t4)
    jax.block_until_ready((t13, t12))

    # Pure-JAX reference of the same (repaired) chain:
    #   t3 = ones(M,K) @ x3 ; t5 = t3*t4 ; t11 = -t5 ; t13 = 1 + t11 ; t12 = 1 - t11
    t3_ref = jnp.einsum("mk,bkn->bmn", jnp.ones((M, K), jnp.float32), x3)
    t5_ref = t3_ref * t4[None]
    t13_ref = 1.0 - t5_ref
    t12_ref = 1.0 + t5_ref
    assert jnp.allclose(t13, t13_ref, atol=1e-4, rtol=1e-4)
    assert jnp.allclose(t12, t12_ref, atol=1e-4, rtol=1e-4)

    print("KERNEL_OK")
</pallas_src>

<mosaic_0001>
module attributes {stable_mosaic.version = 11 : i64} {
  func.func @_model_kernel(%arg0: i32, %arg1: i32, %arg2: memref<2x32x256xf32, #tpu.memory_space<vmem>>, %arg3: memref<8x256xf32, #tpu.memory_space<vmem>>, %arg4: memref<2x8x256xf32, #tpu.memory_space<vmem>>, %arg5: memref<2x8x256xf32, #tpu.memory_space<vmem>>) attributes {dimension_semantics = [#tpu.dimension_semantics<parallel>, #tpu.dimension_semantics<parallel>], iteration_bounds = array<i64: 1, 1>, scalar_prefetch = 0 : i64, scratch_operands = 0 : i64, tpu.core_type = #tpu.core_type<tc>, window_params = [{transform_indices = @transform_0, window_bounds = array<i64: 2, 32, 256>}, {transform_indices = @transform_1, window_bounds = array<i64: 8, 256>}, {transform_indices = @transform_2, window_bounds = array<i64: 2, 8, 256>}, {transform_indices = @transform_3, window_bounds = array<i64: 2, 8, 256>}]} {
    %c0 = arith.constant 0 : index
    %c0_0 = arith.constant 0 : index
    %c0_1 = arith.constant 0 : index
    %0 = vector.load %arg2[%c0, %c0_0, %c0_1] : memref<2x32x256xf32, #tpu.memory_space<vmem>>, vector<2x32x256xf32>
    %cst = arith.constant dense<0.000000e+00> : vector<2x256xf32>
    %1 = vector.multi_reduction <add>, %0, %cst [1] : vector<2x32x256xf32> to vector<2x256xf32>
    %2 = vector.shape_cast %1 : vector<2x256xf32> to vector<2x1x256xf32>
    %c0_2 = arith.constant 0 : index
    %c0_3 = arith.constant 0 : index
    %3 = vector.load %arg3[%c0_2, %c0_3] : memref<8x256xf32, #tpu.memory_space<vmem>>, vector<8x256xf32>
    %4 = vector.shape_cast %3 : vector<8x256xf32> to vector<1x8x256xf32>
    %5 = vector.broadcast %2 : vector<2x1x256xf32> to vector<2x8x256xf32>
    %6 = vector.broadcast %4 : vector<1x8x256xf32> to vector<2x8x256xf32>
    %7 = arith.mulf %5, %6 : vector<2x8x256xf32>
    %cst_4 = arith.constant 1.000000e+00 : f32
    %8 = vector.broadcast %cst_4 : f32 to vector<2x8x256xf32>
    %9 = arith.subf %8, %7 : vector<2x8x256xf32>
    %c0_5 = arith.constant 0 : index
    %c0_6 = arith.constant 0 : index
    %c0_7 = arith.constant 0 : index
    %10 = vector.load %arg4[%c0_5, %c0_6, %c0_7] : memref<2x8x256xf32, #tpu.memory_space<vmem>>, vector<2x8x256xf32>
    tpu.vector_store %arg4[%c0_5, %c0_6, %c0_7], %9 {strides = array<i32>} : memref<2x8x256xf32, #tpu.memory_space<vmem>>, vector<2x8x256xf32>,
    %cst_8 = arith.constant 1.000000e+00 : f32
    %11 = vector.broadcast %cst_8 : f32 to vector<2x8x256xf32>
    %12 = arith.addf %11, %7 : vector<2x8x256xf32>
    %c0_9 = arith.constant 0 : index
    %c0_10 = arith.constant 0 : index
    %c0_11 = arith.constant 0 : index
    %13 = vector.load %arg5[%c0_9, %c0_10, %c0_11] : memref<2x8x256xf32, #tpu.memory_space<vmem>>, vector<2x8x256xf32>
    tpu.vector_store %arg5[%c0_9, %c0_10, %c0_11], %12 {strides = array<i32>} : memref<2x8x256xf32, #tpu.memory_space<vmem>>, vector<2x8x256xf32>,
    return
  }
  func.func @transform_0(%arg0: i32, %arg1: i32) -> (i32, i32, i32) {
    %c0_i32 = arith.constant 0 : i32
    %c0_i32_0 = arith.constant 0 : i32
    return %arg0, %c0_i32, %arg1 : i32, i32, i32
  }
  func.func @transform_1(%arg0: i32, %arg1: i32) -> (i32, i32) {
    %c0_i32 = arith.constant 0 : i32
    %c0_i32_0 = arith.constant 0 : i32
    return %c0_i32, %arg1 : i32, i32
  }
  func.func @transform_2(%arg0: i32, %arg1: i32) -> (i32, i32, i32) {
    %c0_i32 = arith.constant 0 : i32
    %c0_i32_0 = arith.constant 0 : i32
    return %arg0, %c0_i32, %arg1 : i32, i32, i32
  }
  func.func @transform_3(%arg0: i32, %arg1: i32) -> (i32, i32, i32) {
    %c0_i32 = arith.constant 0 : i32
    %c0_i32_0 = arith.constant 0 : i32
    return %arg0, %c0_i32, %arg1 : i32, i32, i32
  }
}

</mosaic_0001>

<bundles_post_ra>
// kernel: tpu_custom_call.1
= control target key start
LH: loop header
LB: loop body
LE: loop exit
PB: predicated region body
PF: predicated region fallthrough
CT: control target
= control target key end

     0   :  { %9 = vsyncpa [#allocation3], 0  ;;  %s314_s0 = inlined_call_operand.hbm [shape: f32[2,32,256], index: 0, kind: input, shape index: {}]   ;;  %s315_s1 = inlined_call_operand.hbm [shape: f32[8,256], index: 1, kind: input, shape index: {}]   ;;  %s316_s2 = inlined_call_operand.hbm [shape: f32[2,8,256], index: 2, kind: output, shape index: {0}]   ;;  %s317_s3 = inlined_call_operand.hbm [shape: f32[2,8,256], index: 3, kind: output, shape index: {1}]  }
   0x1   :  { %10 = vsyncpa [#allocation6], 0 }
   0x2   :  { %11 = vsyncpa [#allocation4], 0 }
   0x3   :  { %12 = vsyncpa [#allocation9], 0  ;;  %s17_s14 = sshll.u32 %s314_s0, 4  ;;  %s267_s15 = smov [#allocation2]   ;;  %s18_s14 = int_to_ptr.hbm [resolvable:$true] %s17_s14 }
   0x4   :  { %s19_s16 = sshll.u32 %s267_s15, 4  ;;  %s31_s19 = sshll.u32 %s315_s1, 4  ;;  %s20_s16 = int_to_ptr.vmem [resolvable:$true] %s19_s16  ;;  %s32_s19 = int_to_ptr.hbm [resolvable:$true] %s31_s19 }
   0x5   :  { %s268_s20 = smov 256   ;;  %s269_s21 = smov 16  }
   0x6   :  { %25 = dma.hbm_to_vmem [thread:$0]  %s18_s14, 2048, %s20_s16, [#allocation3], %s268_s20, %s268_s20, %s269_s21  }
   0x7   :  { %s270_s22 = smov [#allocation5]  }
   0x8   :  { %s33_s23 = sshll.u32 %s270_s22, 4  ;;  %s34_s23 = int_to_ptr.vmem [resolvable:$true] %s33_s23 }
   0x9   :  { %36 = dma.hbm_to_vmem [thread:$0]  %s32_s19, 256, %s34_s23, [#allocation6]  }
   0xa   :  { %259 = dma.done.wait [#allocation3], 2048  }
   0xb   :  { %260 = vsyncadd [#allocation3], 4294965248 }
   0xc   :  { %261 = dma.done.wait [#allocation6], 256  }
   0xd   :  { %262 = vsyncadd [#allocation6], 4294967040  ;;  %v45_v0 = vld [vmem:[#allocation2] sm:$0xff]  ;;  %v47_v1 = vld [vmem:[#allocation2 + $0x10] sm:$0xff]  ;;  %s271_s0 = smov [#allocation7]   ;;  %s125_s26 = sshll.u32 %s316_s2, 4  ;;  %s126_s26 = int_to_ptr.hbm [resolvable:$true] %s125_s26 }
   0xe   :  { %v49_v2 = vld [vmem:[#allocation2 + $0x20] sm:$0xff]  ;;  %v61_v3 = vadd.f32 %v47_v1, %v45_v0  ;;  %v46_v4 = vld [vmem:[#allocation2 + $0x8] sm:$0xff]  ;;  %v51_v5 = vld [vmem:[#allocation2 + $0x30] sm:$0xff]  ;;  %s123_s1 = sshll.u32 %s271_s0, 4  ;;  %s272_s27 = smov [#allocation8]   ;;  %s124_s1 = int_to_ptr.vmem [resolvable:$true] %s123_s1 }
   0xf   :  { %v48_v6 = vld [vmem:[#allocation2 + $0x18] sm:$0xff]  ;;  %v50_v7 = vld [vmem:[#allocation2 + $0x28] sm:$0xff]  ;;  %v53_v10 = vld [vmem:[#allocation2 + $0x40] sm:$0xff]  ;;  %s136_s28 = sshll.u32 %s272_s27, 4  ;;  %s138_s4 = sshll.u32 %s317_s3, 4  ;;  %s137_s28 = int_to_ptr.vmem [resolvable:$true] %s136_s28  ;;  %s139_s4 = int_to_ptr.hbm [resolvable:$true] %s138_s4 }
  0x10   :  { %v62_v8 = vadd.f32 %v61_v3, %v49_v2  ;;  %v70_v9 = vadd.f32 %v48_v6, %v46_v4  ;;  %v55_v11 = vld [vmem:[#allocation2 + $0x50] sm:$0xff]  ;;  %v52_v12 = vld [vmem:[#allocation2 + $0x38] sm:$0xff]  ;;  %v57_v13 = vld [vmem:[#allocation2 + $0x60] sm:$0xff] }
  0x11   :  { %v79_v14 = vadd.f32 %v55_v11, %v53_v10  ;;  %v54_v15 = vld [vmem:[#allocation2 + $0x48] sm:$0xff]  ;;  %v59_v18 = vld [vmem:[#allocation2 + $0x70] sm:$0xff]  ;;  %v56_v19 = vld [vmem:[#allocation2 + $0x58] sm:$0xff] }
  0x12   :  { %v63_v16 = vadd.f32 %v62_v8, %v51_v5  ;;  %v71_v17 = vadd.f32 %v70_v9, %v50_v7  ;;  %v58_v20 = vld [vmem:[#allocation2 + $0x68] sm:$0xff]  ;;  %v88_v22 = vadd.f32 %v56_v19, %v54_v15  ;;  %v60_v25 = vld [vmem:[#allocation2 + $0x78] sm:$0xff]  ;;  %v97_v42 = vld [vmem:[#allocation5] sm:$0xff] }
  0x13   :  { %v80_v21 = vadd.f32 %v79_v14, %v57_v13  ;;  %v98_v47 = vld [vmem:[#allocation5 + $0x8] sm:$0xff] }
  0x14   :  { %v64_v23 = vrot.slane %v63_v16, 4  ;;  %v72_v24 = vadd.f32 %v71_v17, %v52_v12  ;;  %v89_v27 = vadd.f32 %v88_v22, %v58_v20 }
  0x15   :  { %v81_v26 = vadd.f32 %v80_v21, %v59_v18 }
  0x16   :  { %v65_v28 = vadd.f32 %v64_v23, %v63_v16  ;;  %v73_v29 = vrot.slane %v72_v24, 4  ;;  %v90_v31 = vadd.f32 %v89_v27, %v60_v25 }
  0x17   :  { %v82_v30 = vrot.slane %v81_v26, 4 }
  0x18   :  { %v66_v32 = vrot.slane %v65_v28, 2  ;;  %v74_v33 = vadd.f32 %v73_v29, %v72_v24  ;;  %v91_v35 = vrot.slane %v90_v31, 4 }
  0x19   :  { %v83_v34 = vadd.f32 %v82_v30, %v81_v26 }
  0x1a   :  { %v67_v36 = vadd.f32 %v66_v32, %v65_v28  ;;  %v75_v37 = vrot.slane %v74_v33, 2  ;;  %v92_v39 = vadd.f32 %v91_v35, %v90_v31 }
  0x1b   :  { %v84_v38 = vrot.slane %v83_v34, 2 }
  0x1c   :  { %v68_v40 = vrot.slane %v67_v36, 1  ;;  %v76_v41 = vadd.f32 %v75_v37, %v74_v33  ;;  %v93_v44 = vrot.slane %v92_v39, 2 }
  0x1d   :  { %v85_v43 = vadd.f32 %v84_v38, %v83_v34 }
  0x1e   :  { %v69_v45 = vadd.f32 %v68_v40, %v67_v36  ;;  %v77_v46 = vrot.slane %v76_v41, 1  ;;  %v94_v49 = vadd.f32 %v93_v44, %v92_v39 }
  0x1f   :  { %v86_v48 = vrot.slane %v85_v43, 1 }
  0x20   :  { %v99_v50 = vmul.f32 %v97_v42, %v69_v45  ;;  %v78_v51 = vadd.f32 %v77_v46, %v76_v41  ;;  %v95_v53 = vrot.slane %v94_v49, 1 }
  0x21   :  { %v87_v52 = vadd.f32 %v86_v48, %v85_v43 }
  0x22   :  { %v103_v54 = vsub.f32 1.0, %v99_v50  ;;  %v100_v55 = vmul.f32 %v98_v47, %v78_v51  ;;  %v111_v56 = vadd.f32 1.0, %v99_v50  ;;  %v96_v58 = vadd.f32 %v95_v53, %v94_v49 }
  0x23   :  { %v101_v57 = vmul.f32 %v97_v42, %v87_v52 }
  0x24   :  { %107 = vst [vmem:[#allocation7] sm:$0xff] %v103_v54  ;;  %v104_v59 = vsub.f32 1.0, %v100_v55  ;;  %v112_v60 = vadd.f32 1.0, %v100_v55  ;;  %v102_v62 = vmul.f32 %v98_v47, %v96_v58 }
  0x25   :  { %v105_v61 = vsub.f32 1.0, %v101_v57  ;;  %115 = vst [vmem:[#allocation8] sm:$0xff] %v111_v56  ;;  %v113_v63 = vadd.f32 1.0, %v101_v57 }
  0x26   :  { %108 = vst [vmem:[#allocation7 + $0x8] sm:$0xff] %v104_v59  ;;  %v106_v0 = vsub.f32 1.0, %v102_v62  ;;  %v114_v1 = vadd.f32 1.0, %v102_v62 }
  0x27   :  { %109 = vst [vmem:[#allocation7 + $0x10] sm:$0xff] %v105_v61 }
  0x28   :  { %116 = vst [vmem:[#allocation8 + $0x8] sm:$0xff] %v112_v60 }
  0x29   :  { %110 = vst [vmem:[#allocation7 + $0x18] sm:$0xff] %v106_v0 }
  0x2a   :  { %117 = vst [vmem:[#allocation8 + $0x10] sm:$0xff] %v113_v63  ;;  %131 = dma.vmem_to_hbm [thread:$0]  %s124_s1, 512, %s126_s26, [#allocation4], %s268_s20, %s268_s20, %s269_s21  }
  0x2b   :  { %118 = vst [vmem:[#allocation8 + $0x18] sm:$0xff] %v114_v1 }
  0x2c   :  { %144 = dma.vmem_to_hbm [thread:$0]  %s137_s28, 512, %s139_s4, [#allocation9], %s268_s20, %s268_s20, %s269_s21  }
  0x2d   :  { %263 = dma.done.wait [#allocation4], 512  }
  0x2e   :  { %264 = vsyncadd [#allocation4], 4294966784 }
  0x2f   :  { %265 = dma.done.wait [#allocation9], 512  }
  0x30   :  { %266 = vsyncadd [#allocation9], 4294966784 }
  0x31   :  { %153 = vsyncpa [#allocation3], 1 }
  0x32   :  { %154 = vsyncpa [#allocation6], 1 }
  0x33   :  { %155 = vsyncpa [#allocation4], 1 }
  0x34   :  { %156 = vsyncpa [#allocation9], 1 }

</bundles_post_ra>
